<compile_context>
chip_gen: v6e
topology: v6e:2x2x1
jax: 0.10.0
libtpu: 0.0.40
codegen_flags: <defaults>
</compile_context>

<pallas_src>
import functools

import jax
import jax.numpy as jnp
from jax.experimental import pallas as pl
from jax.experimental.pallas import tpu as pltpu


def _round_up(x, m):
    return ((x + m - 1) // m) * m


def _cdiv(a, b):
    return (a + b - 1) // b


def _chip_config():
    """Per-generation knobs: (vmem_limit_bytes or None, n_core_splits, use_bf16)."""
    kind = ""
    try:
        kind = jax.devices()[0].device_kind.lower()
    except Exception:
        pass
    if "v7" in kind:   # 64 MiB physical VMEM, 2 TensorCores/chip, bf16 MXU
        return 48 * 1024 * 1024, 2, True
    if "v6" in kind:   # 128 MiB VMEM, 1 TC, bf16 MXU
        return 100 * 1024 * 1024, 1, True
    if "v5" in kind:   # v5e/v5p: 128 MiB VMEM, 1 TC; keep f32 (weak bf16 VPU path)
        return 96 * 1024 * 1024, 1, False
    # Unknown generation: don't touch the scoped VMEM limit, stay f32, 1 core.
    return None, 1, False


def _vmem_estimate_bytes(tile_n, f_x, G, h, compute_itemsize):
    """Rough per-step VMEM footprint of the aggregation kernel."""
    x_bufs = 2 * tile_n * f_x * 4                 # double-buffered x tiles
    b_bufs = 2 * tile_n * 4                       # double-buffered batch-id rows
    iota = G * tile_n * 4                         # cached (G, TN) iota scratch
    interm = 3 * G * tile_n * compute_itemsize    # one-hot + matmul temporaries
    small = G * h * compute_itemsize + 2 * G * f_x * 4          # qu + out block
    small += (2 * f_x * h + 4 * h + 2 * G * f_x) * 4            # weights / u / bias
    return x_bufs + b_bufs + iota + interm + small + (1 << 20)  # 1 MiB slack


def _pick_tile_n(n_per_split, f_x, G, h, compute_itemsize, vmem_budget):
    # Size the node tile from the data, not a flat constant: target ~2 MiB of x
    # per grid step so the ~0.35 us per-step pipeline overhead is amortized
    # (a 512-row tile at f_x=4 is only 8 KiB of DMA -> far below HBM roofline).
    t = _round_up(max((2 << 20) // (4 * max(f_x, 1)), 512), 128)
    t = min(t, 8192)
    t = min(t, _round_up(max(n_per_split, 1), 128))
    # Shrink until the (G, TN)-sized intermediates fit the per-chip VMEM budget
    # (matters on v7x's 64 MiB and for large G).
    while t > 128 and _vmem_estimate_bytes(t, f_x, G, h, compute_itemsize) > vmem_budget:
        t -= 128
    return max(t, 128)


def _agg_kernel(batch_ref, x_ref, u_ref, wk_ref, bk_ref, wq_ref, bq_ref,
                partial_ref, qu_ref, iota_ref, *, compute_dtype):
    """Grid: (n_split 'parallel', node-tiles 'arbitrary').

    Per node tile:
      k        = x @ wk + bk
      q[batch] = one-hot-gather of qu = u @ wq + bq   (MXU matmul, no transpose)
      a        = sigmoid(sum(k * q, -1))
      partial += one-hot @ (a * x)                    (scatter_add as matmul)
    partial_ref is the per-split (G, f_x) f32 accumulator, resident in VMEM.
    """
    i = pl.program_id(1)

    @pl.when(i == 0)
    def _init():
        partial_ref[...] = jnp.zeros_like(partial_ref)
        # Hoisted iota: built once per split; each tile only does compare+cast,
        # moving work off the saturating VALU slot onto the vld slot.
        iota_ref[...] = jax.lax.broadcasted_iota(jnp.int32, iota_ref.shape, 0)
        qu = (jnp.dot(u_ref[...], wq_ref[...], preferred_element_type=jnp.float32)
              + bq_ref[...])
        qu_ref[...] = qu.astype(qu_ref.dtype)

    batch_row = batch_ref[...]                                    # (1, TN) int32
    # Padded nodes carry id == G -> match no graph -> contribute zero.
    onehot = (iota_ref[...] == batch_row).astype(compute_dtype)   # (G, TN)

    x_tile = x_ref[...]                                           # (TN, f_x) f32
    k = (jnp.dot(x_tile.astype(compute_dtype), wk_ref[...],
                 preferred_element_type=jnp.float32)
         + bk_ref[...])                                           # (TN, h) f32

    # q[batch] gather as a matmul contracting the G axis of both operands.
    q_nodes = jax.lax.dot_general(
        onehot, qu_ref[...],
        dimension_numbers=(((0,), (0,)), ((), ())),
        preferred_element_type=jnp.float32)                       # (TN, h) f32

    a = jax.nn.sigmoid(jnp.sum(k * q_nodes, axis=-1, keepdims=True))  # (TN, 1)

    # scatter_add(a * x, batch): (G, TN) @ (TN, f_x), accumulated in f32.
    ax = (a * x_tile).astype(compute_dtype)
    partial_ref[...] += jnp.dot(onehot, ax, preferred_element_type=jnp.float32)


def _phi_u_kernel(partials_ref, u_ref, w1x_ref, w1u_ref, b1_ref, w2_ref, b2_ref,
                  out_ref, *, n_split):
    """Combine per-split partial x_agg and run phi_u = Linear -> ReLU -> Linear."""
    x_agg = partials_ref[0]
    for s in range(1, n_split):
        x_agg = x_agg + partials_ref[s]
    h1 = (jnp.dot(x_agg, w1x_ref[...], preferred_element_type=jnp.float32)
          + jnp.dot(u_ref[...], w1u_ref[...], preferred_element_type=jnp.float32)
          + b1_ref[...])
    h1 = jnp.maximum(h1, 0.0)
    out_ref[...] = (jnp.dot(h1, w2_ref[...], preferred_element_type=jnp.float32)
                    + b2_ref[...]).astype(out_ref.dtype)


def global_model_node_only_a(x, batch, u, wk, bk, wq, bq, w1, b1, w2, b2,
                             *, tile_n=None, n_split=None, use_bf16=None):
    """Pallas forward of GlobalModel_NodeOnly_A.

    x: (N, f_x) f32, batch: (N,) int, u: (G, f_u) f32.
    wk/bk: phi_k Linear(f_x, h); wq/bq: phi_q Linear(f_u, h).
    w1/b1, w2/b2: phi_u MLP Linear(f_x+f_u, hidden) -> ReLU -> Linear(hidden, f_u_out).
    (edge_index / e of the original forward are unused and omitted.)
    tile_n / n_split / use_bf16 = None -> auto-tuned per TPU generation.
    """
    N, f_x = x.shape
    G, f_u = u.shape
    h = wk.shape[1]
    hidden = w1.shape[1]
    f_u_out = w2.shape[1]
    assert w1.shape[0] == f_x + f_u

    vmem_limit, auto_split, auto_bf16 = _chip_config()
    if n_split is None:
        n_split = auto_split
    if use_bf16 is None:
        use_bf16 = auto_bf16
    compute_dtype = jnp.bfloat16 if use_bf16 else jnp.float32
    compute_itemsize = 2 if use_bf16 else 4

    vmem_budget = (vmem_limit - (8 << 20)) if vmem_limit is not None else (16 << 20)

    n_per_split = _cdiv(N, n_split)
    if tile_n is None:
        tile_n = _pick_tile_n(n_per_split, f_x, G, h, compute_itemsize, vmem_budget)
    else:
        tile_n = _round_up(max(tile_n, 128), 128)
        tile_n = min(tile_n, _round_up(max(n_per_split, 1), 128))

    tiles_per_split = _cdiv(_cdiv(N, tile_n), n_split)
    n_pad = n_split * tiles_per_split * tile_n

    # Node padding: padded rows get batch id == G -> dropped by the one-hot.
    x_p = jnp.pad(x.astype(jnp.float32), ((0, n_pad - N), (0, 0)))
    batch_row = jnp.pad(batch.astype(jnp.int32), (0, n_pad - N),
                        constant_values=G).reshape(1, n_pad)
    u_f32 = u.astype(jnp.float32)

    wk_c = wk.astype(compute_dtype)
    wq_f = wq.astype(jnp.float32)
    bk2 = bk.reshape(1, h).astype(jnp.float32)
    bq2 = bq.reshape(1, h).astype(jnp.float32)

    tps = tiles_per_split
    full = lambda arr: pl.BlockSpec(arr.shape, lambda c, i: (0,) * arr.ndim)

    # ---- Kernel A: streaming node aggregation -> per-split partial x_agg -----
    partials = pl.pallas_call(
        functools.partial(_agg_kernel, compute_dtype=compute_dtype),
        out_shape=jax.ShapeDtypeStruct((n_split, G, f_x), jnp.float32),
        grid=(n_split, tiles_per_split),
        in_specs=[
            pl.BlockSpec((1, tile_n), lambda c, i: (0, c * tps + i)),    # batch ids
            pl.BlockSpec((tile_n, f_x), lambda c, i: (c * tps + i, 0)),  # x tile
            full(u_f32), full(wk_c), full(bk2), full(wq_f), full(bq2),
        ],
        out_specs=pl.BlockSpec((None, G, f_x), lambda c, i: (c, 0, 0)),
        scratch_shapes=[
            pltpu.VMEM((G, h), compute_dtype),    # cached qu = phi_q(u)
            pltpu.VMEM((G, tile_n), jnp.int32),   # cached graph-id iota
        ],
        compiler_params=pltpu.CompilerParams(
            dimension_semantics=("parallel", "arbitrary"),
            vmem_limit_bytes=vmem_limit),
    )(batch_row, x_p, u_f32, wk_c, bk2, wq_f, bq2)

    # ---- Kernel B: combine partials + phi_u (concat eliminated) --------------
    w1x = w1[:f_x, :].astype(jnp.float32)
    w1u = w1[f_x:, :].astype(jnp.float32)
    b1_2d = b1.reshape(1, hidden).astype(jnp.float32)
    f_out_pad = _round_up(f_u_out, 128)            # lane-dense output store
    w2_p = jnp.pad(w2.astype(jnp.float32), ((0, 0), (0, f_out_pad - f_u_out)))
    b2_p = jnp.pad(b2.astype(jnp.float32),
                   (0, f_out_pad - f_u_out)).reshape(1, f_out_pad)

    out = pl.pallas_call(
        functools.partial(_phi_u_kernel, n_split=n_split),
        out_shape=jax.ShapeDtypeStruct((G, f_out_pad), jnp.float32),
    )(partials, u_f32, w1x, w1u, b1_2d, w2_p, b2_p)

    return out[:, :f_u_out]


def reference(x, batch, u, wk, bk, wq, bq, w1, b1, w2, b2):
    """Pure-JAX reference matching the PyTorch forward."""
    G = u.shape[0]
    k = x @ wk + bk
    q = (u @ wq + bq)[batch]
    a = jax.nn.sigmoid(jnp.sum(k * q, axis=-1, keepdims=True))
    onehot = jax.nn.one_hot(batch, G, dtype=x.dtype)          # (N, G)
    x_agg = onehot.T @ (a * x)                                # (G, f_x)
    cat = jnp.concatenate([x_agg, u], axis=1)
    h1 = jnp.maximum(cat @ w1 + b1, 0.0)
    return h1 @ w2 + b2


if __name__ == "__main__":
    key = jax.random.PRNGKey(0)
    (k_x, k_u, k_b, k_wk, k_bk, k_wq, k_bq,
     k_w1, k_b1, k_w2, k_b2) = jax.random.split(key, 11)

    # small shapes: 300 nodes, 2 graphs, f_x=4, f_u=4, h=8, hidden=32, f_u_out=4
    N, G = 300, 2
    f_x, f_u, h, hidden, f_u_out = 4, 4, 8, 32, 4

    x = jax.random.normal(k_x, (N, f_x), dtype=jnp.float32)
    u = jax.random.normal(k_u, (G, f_u), dtype=jnp.float32)
    batch = jax.random.randint(k_b, (N,), 0, G, dtype=jnp.int32)

    wk = jax.random.normal(k_wk, (f_x, h), dtype=jnp.float32) * 0.1
    bk = jax.random.normal(k_bk, (h,), dtype=jnp.float32) * 0.1
    wq = jax.random.normal(k_wq, (f_u, h), dtype=jnp.float32) * 0.1
    bq = jax.random.normal(k_bq, (h,), dtype=jnp.float32) * 0.1
    w1 = jax.random.normal(k_w1, (f_x + f_u, hidden), dtype=jnp.float32) * 0.1
    b1 = jax.random.normal(k_b1, (hidden,), dtype=jnp.float32) * 0.1
    w2 = jax.random.normal(k_w2, (hidden, f_u_out), dtype=jnp.float32) * 0.1
    b2 = jax.random.normal(k_b2, (f_u_out,), dtype=jnp.float32) * 0.1

    ref = reference(x, batch, u, wk, bk, wq, bq, w1, b1, w2, b2)

    # 1) exact-f32 path, multi-tile accumulation (grid (1, 3)).
    out_a = global_model_node_only_a(x, batch, u, wk, bk, wq, bq, w1, b1, w2, b2,
                                     tile_n=128, n_split=1, use_bf16=False)
    out_a = jax.block_until_ready(out_a)
    assert out_a.shape == (G, f_u_out)
    assert jnp.allclose(out_a, ref, atol=1e-4, rtol=1e-4), "f32 path mismatch"

    # 2) exact-f32 path with a forced 2-way core split (grid (2, 2)) exercising
    #    the partial-accumulator combine kernel (serializes on 1-TC chips).
    out_b = global_model_node_only_a(x, batch, u, wk, bk, wq, bq, w1, b1, w2, b2,
                                     tile_n=128, n_split=2, use_bf16=False)
    out_b = jax.block_until_ready(out_b)
    assert jnp.allclose(out_b, ref, atol=1e-4, rtol=1e-4), "split path mismatch"

    # 3) fully auto path (chip-tuned tile size / core split / bf16 MXU inputs).
    out_c = global_model_node_only_a(x, batch, u, wk, bk, wq, bq, w1, b1, w2, b2)
    out_c = jax.block_until_ready(out_c)
    assert jnp.allclose(out_c, ref, atol=5e-2, rtol=5e-2), "auto path mismatch"

    print("KERNEL_OK")
</pallas_src>

<mosaic_0001>
module attributes {stable_mosaic.version = 11 : i64} {
  func.func @_agg_kernel(%arg0: i32, %arg1: i32, %arg2: memref<1x128xi32, #tpu.memory_space<vmem>>, %arg3: memref<128x4xf32, #tpu.memory_space<vmem>>, %arg4: memref<2x4xf32, #tpu.memory_space<vmem>>, %arg5: memref<4x8xf32, #tpu.memory_space<vmem>>, %arg6: memref<1x8xf32, #tpu.memory_space<vmem>>, %arg7: memref<4x8xf32, #tpu.memory_space<vmem>>, %arg8: memref<1x8xf32, #tpu.memory_space<vmem>>, %arg9: memref<1x2x4xf32, #tpu.memory_space<vmem>>, %arg10: memref<2x8xf32, #tpu.memory_space<vmem>>, %arg11: memref<2x128xi32, #tpu.memory_space<vmem>>) attributes {dimension_semantics = [#tpu.dimension_semantics<parallel>, #tpu.dimension_semantics<arbitrary>], iteration_bounds = array<i64: 1, 3>, scalar_prefetch = 0 : i64, scratch_operands = 2 : i64, tpu.core_type = #tpu.core_type<tc>, window_params = [{transform_indices = @transform_0, window_bounds = array<i64: 1, 128>}, {transform_indices = @transform_1, window_bounds = array<i64: 128, 4>}, {pipeline_mode = #tpu.pipeline_mode<synchronous>, transform_indices = @transform_2, window_bounds = array<i64: 2, 4>}, {pipeline_mode = #tpu.pipeline_mode<synchronous>, transform_indices = @transform_3, window_bounds = array<i64: 4, 8>}, {pipeline_mode = #tpu.pipeline_mode<synchronous>, transform_indices = @transform_4, window_bounds = array<i64: 1, 8>}, {pipeline_mode = #tpu.pipeline_mode<synchronous>, transform_indices = @transform_5, window_bounds = array<i64: 4, 8>}, {pipeline_mode = #tpu.pipeline_mode<synchronous>, transform_indices = @transform_6, window_bounds = array<i64: 1, 8>}, {transform_indices = @transform_7, window_bounds = array<i64: 1, 2, 4>}]} {
    %c0_i32 = arith.constant 0 : i32
    %0 = arith.cmpi eq, %arg1, %c0_i32 : i32
    %1 = arith.extui %0 : i1 to i32
    %c0_i32_0 = arith.constant 0 : i32
    %2 = arith.cmpi ne, %1, %c0_i32_0 : i32
    scf.if %2 {
      %cst_22 = arith.constant 0.000000e+00 : f32
      %34 = vector.broadcast %cst_22 : f32 to vector<2x4xf32>
      %c0_23 = arith.constant 0 : index
      %c0_24 = arith.constant 0 : index
      %c0_25 = arith.constant 0 : index
      %35 = vector.load %arg9[%c0_23, %c0_24, %c0_25] : memref<1x2x4xf32, #tpu.memory_space<vmem>>, vector<1x2x4xf32>
      %36 = vector.shape_cast %35 : vector<1x2x4xf32> to vector<2x4xf32>
      %37 = vector.shape_cast %34 : vector<2x4xf32> to vector<1x2x4xf32>
      tpu.vector_store %arg9[%c0_23, %c0_24, %c0_25], %37 {strides = array<i32>} : memref<1x2x4xf32, #tpu.memory_space<vmem>>, vector<1x2x4xf32>,
      %38 = tpu.iota {dimensions = array<i32: 0>} : vector<2x128xi32>
      %c0_26 = arith.constant 0 : index
      %c0_27 = arith.constant 0 : index
      %39 = vector.load %arg11[%c0_26, %c0_27] : memref<2x128xi32, #tpu.memory_space<vmem>>, vector<2x128xi32>
      tpu.vector_store %arg11[%c0_26, %c0_27], %38 {strides = array<i32>} : memref<2x128xi32, #tpu.memory_space<vmem>>, vector<2x128xi32>,
      %c0_28 = arith.constant 0 : index
      %c0_29 = arith.constant 0 : index
      %40 = vector.load %arg4[%c0_28, %c0_29] : memref<2x4xf32, #tpu.memory_space<vmem>>, vector<2x4xf32>
      %c0_30 = arith.constant 0 : index
      %c0_31 = arith.constant 0 : index
      %41 = vector.load %arg7[%c0_30, %c0_31] : memref<4x8xf32, #tpu.memory_space<vmem>>, vector<4x8xf32>
      %cst_32 = arith.constant dense<0.000000e+00> : vector<2x8xf32>
      %42 = tpu.matmul %40, %41, %cst_32 {dimension_numbers = #tpu.dot_dimension_numbers<[1], [0], [0], [1], [0, 0, 1, 1], [], []>} : vector<2x4xf32>, vector<4x8xf32>, vector<2x8xf32> -> vector<2x8xf32>
      %c0_33 = arith.constant 0 : index
      %c0_34 = arith.constant 0 : index
      %43 = vector.load %arg8[%c0_33, %c0_34] : memref<1x8xf32, #tpu.memory_space<vmem>>, vector<1x8xf32>
      %44 = vector.broadcast %43 : vector<1x8xf32> to vector<2x8xf32>
      %45 = arith.addf %42, %44 : vector<2x8xf32>
      %c0_35 = arith.constant 0 : index
      %c0_36 = arith.constant 0 : index
      %46 = vector.load %arg10[%c0_35, %c0_36] : memref<2x8xf32, #tpu.memory_space<vmem>>, vector<2x8xf32>
      tpu.vector_store %arg10[%c0_35, %c0_36], %45 {strides = array<i32>} : memref<2x8xf32, #tpu.memory_space<vmem>>, vector<2x8xf32>,
    } else {
    }
    %c0 = arith.constant 0 : index
    %c0_1 = arith.constant 0 : index
    %3 = vector.load %arg2[%c0, %c0_1] : memref<1x128xi32, #tpu.memory_space<vmem>>, vector<1x128xi32>
    %c0_2 = arith.constant 0 : index
    %c0_3 = arith.constant 0 : index
    %4 = vector.load %arg11[%c0_2, %c0_3] : memref<2x128xi32, #tpu.memory_space<vmem>>, vector<2x128xi32>
    %5 = vector.broadcast %3 : vector<1x128xi32> to vector<2x128xi32>
    %6 = arith.cmpi eq, %4, %5 : vector<2x128xi32>
    %7 = arith.extui %6 : vector<2x128xi1> to vector<2x128xi32>
    %8 = arith.sitofp %7 : vector<2x128xi32> to vector<2x128xf32>
    %c0_4 = arith.constant 0 : index
    %c0_5 = arith.constant 0 : index
    %9 = vector.load %arg3[%c0_4, %c0_5] : memref<128x4xf32, #tpu.memory_space<vmem>>, vector<128x4xf32>
    %c0_6 = arith.constant 0 : index
    %c0_7 = arith.constant 0 : index
    %10 = vector.load %arg5[%c0_6, %c0_7] : memref<4x8xf32, #tpu.memory_space<vmem>>, vector<4x8xf32>
    %cst = arith.constant dense<0.000000e+00> : vector<128x8xf32>
    %11 = tpu.matmul %9, %10, %cst {dimension_numbers = #tpu.dot_dimension_numbers<[1], [0], [0], [1], [0, 0, 1, 1], [], []>} : vector<128x4xf32>, vector<4x8xf32>, vector<128x8xf32> -> vector<128x8xf32>
    %c0_8 = arith.constant 0 : index
    %c0_9 = arith.constant 0 : index
    %12 = vector.load %arg6[%c0_8, %c0_9] : memref<1x8xf32, #tpu.memory_space<vmem>>, vector<1x8xf32>
    %13 = vector.broadcast %12 : vector<1x8xf32> to vector<128x8xf32>
    %14 = arith.addf %11, %13 : vector<128x8xf32>
    %c0_10 = arith.constant 0 : index
    %c0_11 = arith.constant 0 : index
    %15 = vector.load %arg10[%c0_10, %c0_11] : memref<2x8xf32, #tpu.memory_space<vmem>>, vector<2x8xf32>
    %cst_12 = arith.constant dense<0.000000e+00> : vector<128x8xf32>
    %16 = tpu.matmul %8, %15, %cst_12 {dimension_numbers = #tpu.dot_dimension_numbers<[0], [0], [1], [1], [0, 1, 1, 1], [], []>} : vector<2x128xf32>, vector<2x8xf32>, vector<128x8xf32> -> vector<128x8xf32>
    %17 = arith.mulf %14, %16 : vector<128x8xf32>
    %cst_13 = arith.constant dense<0.000000e+00> : vector<128xf32>
    %18 = vector.multi_reduction <add>, %17, %cst_13 [1] : vector<128x8xf32> to vector<128xf32>
    %19 = vector.shape_cast %18 : vector<128xf32> to vector<128x1xf32>
    %20 = arith.negf %19 : vector<128x1xf32>
    %21 = math.exp %20 : vector<128x1xf32>
    %cst_14 = arith.constant 1.000000e+00 : f32
    %22 = vector.broadcast %cst_14 : f32 to vector<128x1xf32>
    %23 = arith.addf %22, %21 : vector<128x1xf32>
    %24 = arith.divf %22, %23 : vector<128x1xf32>
    %25 = vector.broadcast %24 : vector<128x1xf32> to vector<128x4xf32>
    %26 = arith.mulf %25, %9 : vector<128x4xf32>
    %c0_15 = arith.constant 0 : index
    %c0_16 = arith.constant 0 : index
    %c0_17 = arith.constant 0 : index
    %27 = vector.load %arg9[%c0_15, %c0_16, %c0_17] : memref<1x2x4xf32, #tpu.memory_space<vmem>>, vector<1x2x4xf32>
    %28 = vector.shape_cast %27 : vector<1x2x4xf32> to vector<2x4xf32>
    %cst_18 = arith.constant dense<0.000000e+00> : vector<2x4xf32>
    %29 = tpu.matmul %8, %26, %cst_18 {dimension_numbers = #tpu.dot_dimension_numbers<[1], [0], [0], [1], [0, 0, 1, 1], [], []>} : vector<2x128xf32>, vector<128x4xf32>, vector<2x4xf32> -> vector<2x4xf32>
    %30 = arith.addf %28, %29 : vector<2x4xf32>
    %c0_19 = arith.constant 0 : index
    %c0_20 = arith.constant 0 : index
    %c0_21 = arith.constant 0 : index
    %31 = vector.load %arg9[%c0_19, %c0_20, %c0_21] : memref<1x2x4xf32, #tpu.memory_space<vmem>>, vector<1x2x4xf32>
    %32 = vector.shape_cast %31 : vector<1x2x4xf32> to vector<2x4xf32>
    %33 = vector.shape_cast %30 : vector<2x4xf32> to vector<1x2x4xf32>
    tpu.vector_store %arg9[%c0_19, %c0_20, %c0_21], %33 {strides = array<i32>} : memref<1x2x4xf32, #tpu.memory_space<vmem>>, vector<1x2x4xf32>,
    return
  }
  func.func @transform_0(%arg0: i32, %arg1: i32) -> (i32, i32) {
    %c3_i32 = arith.constant 3 : i32
    %0 = arith.muli %arg0, %c3_i32 : i32
    %1 = arith.addi %0, %arg1 : i32
    %c0_i32 = arith.constant 0 : i32
    %c0_i32_0 = arith.constant 0 : i32
    return %c0_i32, %1 : i32, i32
  }
  func.func @transform_1(%arg0: i32, %arg1: i32) -> (i32, i32) {
    %c3_i32 = arith.constant 3 : i32
    %0 = arith.muli %arg0, %c3_i32 : i32
    %1 = arith.addi %0, %arg1 : i32
    %c0_i32 = arith.constant 0 : i32
    %c0_i32_0 = arith.constant 0 : i32
    return %1, %c0_i32 : i32, i32
  }
  func.func @transform_2(%arg0: i32, %arg1: i32) -> (i32, i32) {
    %c0_i32 = arith.constant 0 : i32
    %c0_i32_0 = arith.constant 0 : i32
    %c0_i32_1 = arith.constant 0 : i32
    return %c0_i32, %c0_i32_0 : i32, i32
  }
  func.func @transform_3(%arg0: i32, %arg1: i32) -> (i32, i32) {
    %c0_i32 = arith.constant 0 : i32
    %c0_i32_0 = arith.constant 0 : i32
    %c0_i32_1 = arith.constant 0 : i32
    return %c0_i32, %c0_i32_0 : i32, i32
  }
  func.func @transform_4(%arg0: i32, %arg1: i32) -> (i32, i32) {
    %c0_i32 = arith.constant 0 : i32
    %c0_i32_0 = arith.constant 0 : i32
    %c0_i32_1 = arith.constant 0 : i32
    return %c0_i32, %c0_i32_0 : i32, i32
  }
  func.func @transform_5(%arg0: i32, %arg1: i32) -> (i32, i32) {
    %c0_i32 = arith.constant 0 : i32
    %c0_i32_0 = arith.constant 0 : i32
    %c0_i32_1 = arith.constant 0 : i32
    return %c0_i32, %c0_i32_0 : i32, i32
  }
  func.func @transform_6(%arg0: i32, %arg1: i32) -> (i32, i32) {
    %c0_i32 = arith.constant 0 : i32
    %c0_i32_0 = arith.constant 0 : i32
    %c0_i32_1 = arith.constant 0 : i32
    return %c0_i32, %c0_i32_0 : i32, i32
  }
  func.func @transform_7(%arg0: i32, %arg1: i32) -> (i32, i32, i32) {
    %c0_i32 = arith.constant 0 : i32
    %c0_i32_0 = arith.constant 0 : i32
    %c0_i32_1 = arith.constant 0 : i32
    return %arg0, %c0_i32, %c0_i32_0 : i32, i32, i32
  }
}

</mosaic_0001>

<bundles_post_ra>
// kernel: tpu_custom_call.1
= control target key start
LH: loop header
LB: loop body
LE: loop exit
PB: predicated region body
PF: predicated region fallthrough
CT: control target
= control target key end

     0   :  { %12 = vsyncpa [#allocation5], 0  ;;  %s1616_s24 = smov 0   ;;  %s1618_s25 = smov 0   ;;  %s1884_s0 = inlined_call_operand.vmem [shape: s32[1,384], index: 0, kind: input, shape index: {}]   ;;  %s1885_s1 = inlined_call_operand.vmem [shape: f32[384,4], index: 1, kind: input, shape index: {}]   ;;  %s1886_s2 = inlined_call_operand.vmem [shape: f32[2,4], index: 2, kind: input, shape index: {}]   ;;  %s1887_s3 = inlined_call_operand.vmem [shape: f32[4,8], index: 3, kind: input, shape index: {}]   ;;  %s1888_s4 = inlined_call_operand.vmem [shape: f32[1,8], index: 4, kind: input, shape index: {}]   ;;  %s1889_s5 = inlined_call_operand.vmem [shape: f32[4,8], index: 5, kind: input, shape index: {}]   ;;  %s1890_s6 = inlined_call_operand.vmem [shape: f32[1,8], index: 6, kind: input, shape index: {}]   ;;  %s1891_s7 = inlined_call_operand.hbm [shape: f32[1,2,4], index: 7, kind: output, shape index: {}]  }
   0x1   :  { %s1620_s26 = smov 0  }
   0x2 LB: > { %s1205_s27 = sadd.s32 4294967295, %s1568_s26   ;;  %s27_s28 = sadd.s32 1, %s1564_s25  ;;  %s1568_s26 = sphi %s1620_s26, %s18_s26   ;;  %s1564_s25 = sphi %s1618_s25, %s1894_s25   ;;  %s1560_s24 = sphi %s1616_s24, %s1893_s24  }
   0x3   : > { %p28_p0 = scmp.ge.s32.totalorder %s27_s28, 3  ;;  %p1208_p1 = scmp.ge.s32.totalorder %s1568_s26, 1 }
   0x4   : > { %p275_p2 = scmp.lt.s32.totalorder %s1568_s26, 4 }
   0x5   : > { %s1896_s28 = smov (%p28_p0, %s27_s28), 0 }
   0x6   : > { %p276_p3 = pnand %p1208_p1, %p275_p2 }
   0x7   : > { %p311_p4 = scmp.lt.s32.totalorder (!%p276_p3), %s1560_s24, 2  ;;  %s1209_s29 = sshll.u32 (!%p276_p3), %s1560_s24, 4 }
   0x8   : > { %279 = sbr.rel (%p276_p3) target bundleno = 1024 (0x400), region = 48  ;;  %p319_p5 = scmp.lt.s32.totalorder (!%p276_p3), %s1209_s29, 47 }
   0x9   : > { %p1211_p6 = scmp.ne.s32.totalorder (!%p276_p3), %s1560_s24, 0 }
   0xd   : > { %s1635_s30 = scalar_select %p311_p4, %s1560_s24, 2 }
   0xe   : > { %s1898_s29 = smov (!%p319_p5, %s1209_s29), 47  ;;  %329 = sbr.rel (%p1211_p6) target bundleno = 218 (0xda), region = 52 }
   0xf   : > { %s313_s10 = scalar_lea.vmem %s1884_s0, %s1635_s30  ;;  %s1210_s11 = sshll.u32 %s1898_s29, 3 }
  0x10   : > { %s1644_s14 = scalar_lea.vmem %s1885_s1, %s1210_s11 }
  0x13   : > { %vm330_vm0 = vcmask 25600   ;;  %v332_v0 = vlaneseq  ;;  %v336_v1 = vld [vmem:[%s1889_s5] sm:$0xf]  ;;  %vm348_vm1 = vcmask 1043456   ;;  %v1570_v2 = vmov 0.0  }
  0x14   : > { %331 = vst.msk [vmem:[#allocation4] sm:$0x3] %vm330_vm0, %v1570_v2  ;;  %1326 = vmatprep.subr.mxu0 %v1570_v2  ;;  %v335_v3 = vld [vmem:[%s1886_s2] sm:$0x3]  ;;  %vm344_vm2 = vcmask 31744   ;;  %vm1571_vm3 = vmmov 0  }
  0x15   : > { %v333_v4 = vshrl.u32 %v332_v0, 7  ;;  %1327 = vmatpush3.msk.msra.mxu0 %vm348_vm1, %v336_v1  ;;  %1328 = vmatprep.mubr.msk.f32.mxu0 %vm1571_vm3, %v1570_v2  ;;  %v1212_v5 = vld [vmem:[%s1890_s6] ss:$0 sm:$0xff]  ;;  %vm422_vm4 = vcmask 58368  }
  0x16   : > { %1329 = vmatmul.mubr.msk.f32.vlgmr.msra.gmra.mxu0 %vm344_vm2, %v335_v3 }
  0x17   : > { %334 = vst [vmem:[#allocation3] sm:$0x3] %v333_v4 }
  0xd6   : > { %v418_v6 = vpop.f32.mrf.mxu0 }
  0xd7   : > { %v419_v7 = vadd.f32 %v1212_v5, %v418_v6 }
  0xd8   : > { %v1330_v8 = vpop.f32.mrf.mxu0 }
  0xd9   : > { %423 = vst.msk [vmem:[#allocation2] sm:$0x3] %vm422_vm4, %v419_v7 }
  0xda PF: > { %v1655_v9 = vld [vmem:[%s313_s10] ss:$0 sm:$0xff]  ;;  %v1657_v10 = vld [vmem:[#allocation3] sm:$0x3]  ;;  %vm506_vm5 = vcmask 1043456   ;;  %vm457_vm7 = vcmask 31744  }
  0xdb   : > { %vm430_vm6 = vcmp.eq.s32.totalorder %v1657_v10, %v1655_v9  ;;  %v449_v11 = vld [vmem:[%s1887_s3] sm:$0xf]  ;;  %v1668_v13 = vld [vmem:[%s1644_s14 + $0x8] sm:$0xff]  ;;  %v1572_v14 = vmov 0.0   ;;  %vm737_vm8 = vcmask 1041408   ;;  %v1680_v17 = vld [vmem:[%s1644_s14 + $0x10] sm:$0xff] }
  0xdc   : > { %v1665_v12 = vld [vmem:[%s1644_s14] sm:$0xff]  ;;  %v1216_v15 = vsel %vm430_vm6, 1.0, %v1572_v14  ;;  %1331 = vmatprep.subr.msk.mxu0 %vm506_vm5, %v449_v11  ;;  %v1683_v18 = vld [vmem:[%s1644_s14 + $0x18] sm:$0xff]  ;;  %v1693_v20 = vld [vmem:[%s1644_s14 + $0x28] sm:$0xff]  ;;  %vm688_vm9 = vcmask 15360   ;;  %vm902_vm10 = vcmask 64512  }
  0xdd   : > { %1333 = vmatprep.mubr.msk.f32.mxu0 %vm457_vm7, %v1665_v12  ;;  %656 = vxpose.xlu0.b32.start.end [1/1] (short) %v1216_v15, 128  ;;  %v1690_v19 = vld [vmem:[%s1644_s14 + $0x20] sm:$0xff]  ;;  %v1700_v21 = vld [vmem:[%s1644_s14 + $0x30] sm:$0xff]  ;;  %v1703_v22 = vld [vmem:[%s1644_s14 + $0x38] sm:$0xff]  ;;  %vm1573_vm11 = vmmov 0   ;;  %s1575_s29 = smov [#allocation4]   ;;  %vm1135_vm12 = vcmask 25600  }
  0xde   : > { %1332 = vmatpush3.msk.msra.mxu0 %vm506_vm5, %v449_v11  ;;  %v1710_v23 = vld [vmem:[%s1644_s14 + $0x40] sm:$0xff]  ;;  %v1713_v24 = vld [vmem:[%s1644_s14 + $0x48] sm:$0xff]  ;;  %v1720_v25 = vld [vmem:[%s1644_s14 + $0x50] sm:$0xff]  ;;  %s1146_s30 = sshll.u32 %s1575_s29, 4  ;;  %p1860_p7 = scmp.eq.s32.totalorder %s1205_s27, 2  ;;  %s1147_s30 = int_to_ptr.vmem [resolvable:$true] %s1146_s30 }
  0xdf   : > { %1334 = vmatmul.mubr.msk.f32.vlgmr.msra.gmra.mxu0 %vm457_vm7, %v1668_v13  ;;  %1383 = vmatprep.subr.mxu0 %v1572_v14  ;;  %v1723_v26 = vld [vmem:[%s1644_s14 + $0x58] sm:$0xff]  ;;  %v1730_v27 = vld [vmem:[%s1644_s14 + $0x60] sm:$0xff]  ;;  %v1735_v28 = vld [vmem:[%s1644_s14 + $0x68] sm:$0xff]  ;;  %s1518_s9 = scalar_lea.vmem %s1147_s30, 32  ;;  %p1525_p11 = scmp.lt.s32.totalorder %s1147_s30, %s1147_s30 }
  0xe0   : > { %v655_v16 = vld [vmem:[#allocation2] sm:$0x3]  ;;  %1336 = vmatprep.mubr.msk.f32.mxu0 %vm457_vm7, %v1680_v17  ;;  %v1740_v29 = vld [vmem:[%s1644_s14 + $0x70] sm:$0xff]  ;;  %v1743_v30 = vld [vmem:[%s1644_s14 + $0x78] sm:$0xff]  ;;  %p1519_p8 = scmp.ne.s32.totalorder %s1147_s30, %s1518_s9  ;;  %p1526_p12 = scmp.lt.s32.totalorder %s1518_s9, %s1518_s9 }
  0xe1   : > { %1357 = vmatprep.subr.msk.mxu1 %vm737_vm8, %v655_v16  ;;  %v1768_v48 = vld [vmem:[%s1888_s4] ss:$0 sm:$0xff] }
  0xe2   : > { %1358 = vmatpush3.msk.msra.mxu1 %vm737_vm8, %v655_v16  ;;  %p1520_p9 = pnand %p1519_p8, %p1860_p7  ;;  %p1527_p13 = por %p1526_p12, %p1525_p11 }
  0xe3   : > { %1337 = vmatmul.mubr.msk.f32.gmra.mxu0 %vm457_vm7, %v1683_v18 }
  0xe4   : > { %1339 = vmatprep.mubr.msk.f32.mxu0 %vm457_vm7, %v1690_v19  ;;  %p1521_p10 = pneg %p1520_p9 }
  0xe6   : > { %p1528_p0 = pnand %p1527_p13, %p1521_p10 }
  0xe7   : > { %1340 = vmatmul.mubr.msk.f32.gmra.mxu0 %vm457_vm7, %v1693_v20 }
  0xe8   : > { %1342 = vmatprep.mubr.msk.f32.mxu0 %vm457_vm7, %v1700_v21 }
  0xeb   : > { %1343 = vmatmul.mubr.msk.f32.gmra.mxu0 %vm457_vm7, %v1703_v22 }
  0xec   : > { %1345 = vmatprep.mubr.msk.f32.mxu0 %vm457_vm7, %v1710_v23 }
  0xef   : > { %1346 = vmatmul.mubr.msk.f32.gmra.mxu0 %vm457_vm7, %v1713_v24 }
  0xf0   : > { %1348 = vmatprep.mubr.msk.f32.mxu0 %vm457_vm7, %v1720_v25 }
  0xf3   : > { %1349 = vmatmul.mubr.msk.f32.gmra.mxu0 %vm457_vm7, %v1723_v26 }
  0xf4   : > { %1351 = vmatprep.mubr.msk.f32.mxu0 %vm457_vm7, %v1730_v27 }
  0xf7   : > { %1352 = vmatmul.mubr.msk.f32.gmra.mxu0 %vm457_vm7, %v1735_v28 }
  0xf8   : > { %1354 = vmatprep.mubr.msk.f32.mxu0 %vm457_vm7, %v1740_v29 }
  0xfb   : > { %1355 = vmatmul.mubr.msk.f32.gmra.mxu0 %vm457_vm7, %v1743_v30 }
  0xfc   : > { %1415 = vmatprep.mubr.msk.f32.mxu0 %vm1573_vm11, %v1572_v14 }
 0x159   : > { %v672_v31 = vpop.trf.xlu0 }
 0x15a   : > { %1359 = vmatprep.mubr.msk.f32.mxu1 %vm688_vm9, %v672_v31 }
 0x15d   : > { %v673_v32 = vpop.trf.xlu0 }
 0x15e   : > { %1360 = vmatmul.mubr.msk.f32.vlgmr.msra.gmra.mxu1 %vm688_vm9, %v673_v32 }
 0x161   : > { %v674_v33 = vpop.trf.xlu0 }
 0x162   : > { %1362 = vmatprep.mubr.msk.f32.mxu1 %vm688_vm9, %v674_v33 }
 0x165   : > { %v675_v34 = vpop.trf.xlu0 }
 0x166   : > { %1363 = vmatmul.mubr.msk.f32.gmra.mxu1 %vm688_vm9, %v675_v34 }
 0x169   : > { %v676_v35 = vpop.trf.xlu0 }
 0x16a   : > { %1365 = vmatprep.mubr.msk.f32.mxu1 %vm688_vm9, %v676_v35 }
 0x16d   : > { %v677_v36 = vpop.trf.xlu0 }
 0x16e   : > { %1366 = vmatmul.mubr.msk.f32.gmra.mxu1 %vm688_vm9, %v677_v36 }
 0x171   : > { %v678_v37 = vpop.trf.xlu0 }
 0x172   : > { %1368 = vmatprep.mubr.msk.f32.mxu1 %vm688_vm9, %v678_v37 }
 0x175   : > { %v679_v38 = vpop.trf.xlu0 }
 0x176   : > { %1369 = vmatmul.mubr.msk.f32.gmra.mxu1 %vm688_vm9, %v679_v38 }
 0x179   : > { %v680_v39 = vpop.trf.xlu0 }
 0x17a   : > { %1371 = vmatprep.mubr.msk.f32.mxu1 %vm688_vm9, %v680_v39 }
 0x17d   : > { %v681_v40 = vpop.trf.xlu0 }
 0x17e   : > { %1372 = vmatmul.mubr.msk.f32.gmra.mxu1 %vm688_vm9, %v681_v40 }
 0x181   : > { %v682_v41 = vpop.trf.xlu0 }
 0x182   : > { %1374 = vmatprep.mubr.msk.f32.mxu1 %vm688_vm9, %v682_v41 }
 0x185   : > { %v683_v42 = vpop.trf.xlu0 }
 0x186   : > { %1375 = vmatmul.mubr.msk.f32.gmra.mxu1 %vm688_vm9, %v683_v42 }
 0x189   : > { %v684_v43 = vpop.trf.xlu0 }
 0x18a   : > { %1377 = vmatprep.mubr.msk.f32.mxu1 %vm688_vm9, %v684_v43 }
 0x18d   : > { %v685_v44 = vpop.trf.xlu0 }
 0x18e   : > { %1378 = vmatmul.mubr.msk.f32.gmra.mxu1 %vm688_vm9, %v685_v44 }
 0x191   : > { %v686_v45 = vpop.trf.xlu0 }
 0x192   : > { %1380 = vmatprep.mubr.msk.f32.mxu1 %vm688_vm9, %v686_v45 }
 0x195   : > { %v687_v46 = vpop.trf.xlu0 }
 0x196   : > { %1381 = vmatmul.mubr.msk.f32.gmra.mxu1 %vm688_vm9, %v687_v46 }
 0x19f   : > { %v1335_v47 = vpop.f32.mrf.mxu0 }
 0x1a0   : > { %v582_v50 = vadd.f32 %v1335_v47, %v1768_v48 }
 0x1a1   : > { %v576_v49 = vpop.f32.mrf.mxu0 }
 0x1a2   : > { %v577_v51 = vadd.f32 %v1768_v48, %v576_v49 }
 0x1a3   : > { %v1338_v53 = vpop.f32.mrf.mxu0 }
 0x1a4   : > { %v592_v58 = vadd.f32 %v1338_v53, %v1768_v48 }
 0x1a5   : > { %v586_v57 = vpop.f32.mrf.mxu0 }
 0x1a6   : > { %v587_v59 = vadd.f32 %v1768_v48, %v586_v57 }
 0x1a7   : > { %v1341_v0 = vpop.f32.mrf.mxu0 }
 0x1a9   : > { %v1782_v1 = vpop.f32.mrf.mxu0 }
 0x1ab   : > { %v1344_v3 = vpop.f32.mrf.mxu0 }
 0x1ad   : > { %v606_v5 = vpop.f32.mrf.mxu0 }
 0x1af   : > { %v1347_v7 = vpop.f32.mrf.mxu0 }
 0x1b0   : > { %v622_v53 = vadd.f32 %v1347_v7, %v1768_v48 }
 0x1b1   : > { %v616_v11 = vpop.f32.mrf.mxu0 }
 0x1b3   : > { %v1350_v16 = vpop.f32.mrf.mxu0 }
 0x1b4   : > { %v632_v42 = vadd.f32 %v1350_v16, %v1768_v48  ;;  %v612_v16 = vadd.f32 %v1344_v3, %v1768_v48  ;;  %v602_v3 = vadd.f32 %v1341_v0, %v1768_v48 }
 0x1b5   : > { %v626_v32 = vpop.f32.mrf.mxu0 }
 0x1b6   : > { %v627_v47 = vadd.f32 %v1768_v48, %v626_v32 }
 0x1b7   : > { %v1353_v34 = vpop.f32.mrf.mxu0 }
 0x1b8   : > { %v642_v35 = vadd.f32 %v1353_v34, %v1768_v48 }
 0x1b9   : > { %v636_v37 = vpop.f32.mrf.mxu0 }
 0x1ba   : > { %v637_v39 = vadd.f32 %v1768_v48, %v636_v37 }
 0x1bb   : > { %v1356_v45 = vpop.f32.mrf.mxu0 }
 0x1bc   : > { %v652_v46 = vadd.f32 %v1356_v45, %v1768_v48 }
 0x1bd   : > { %v646_v7 = vpop.f32.mrf.mxu0 }
 0x21e   : > { %v1361_v52 = vpop.f32.mrf.mxu1 }
 0x21f   : > { %v1772_v54 = vmul.f32 %v1361_v52, %v582_v50 }
 0x220   : > { %v807_v55 = vpop.f32.mrf.mxu1 }
 0x221   : > { %v1774_v56 = vmul.f32 %v807_v55, %v577_v51 }
 0x226   : > { %v1364_v60 = vpop.f32.mrf.mxu1 }
 0x227   : > { %v1778_v61 = vmul.f32 %v1364_v60, %v592_v58 }
 0x228   : > { %v817_v62 = vpop.f32.mrf.mxu1 }
 0x229   : > { %v1780_v63 = vmul.f32 %v817_v62, %v587_v59  ;;  %v617_v59 = vadd.f32 %v1768_v48, %v616_v11  ;;  %v607_v11 = vadd.f32 %v1768_v48, %v606_v5  ;;  %v912_v0 = vsel %vm902_vm10, %v1778_v61, 0.0 }
 0x22e   : > { %v1784_v2 = vpop.f32.mrf.mxu1 }
 0x230   : > { %v1786_v4 = vpop.f32.mrf.mxu1 }
 0x236   : > { %v1370_v6 = vpop.f32.mrf.mxu1 }
 0x237   : > { %v893_v34 = vmul.f32 %v1370_v6, %v612_v16  ;;  %v597_v6 = vadd.f32 %v1768_v48, %v1782_v1  ;;  %v906_v1 = vsel %vm902_vm10, %v1772_v54, 0.0 }
 0x238   : > { %v837_v8 = vpop.f32.mrf.mxu1 }
 0x239   : > { %v890_v5 = vmul.f32 %v1786_v4, %v597_v6 }
 0x23e   : > { %v1373_v15 = vpop.f32.mrf.mxu1 }
 0x23f   : > { %v895_v60 = vmul.f32 %v1373_v15, %v622_v53 }
 0x240   : > { %v847_v31 = vpop.f32.mrf.mxu1 }
 0x241   : > { %v894_v32 = vmul.f32 %v847_v31, %v617_v59  ;;  %v892_v31 = vmul.f32 %v837_v8, %v607_v11 }
 0x246   : > { %v1376_v33 = vpop.f32.mrf.mxu1 }
 0x247   : > { %v897_v49 = vmul.f32 %v1376_v33, %v632_v42  ;;  %v930_v33 = vsel %vm902_vm10, %v895_v60, 0.0 }
 0x248   : > { %v857_v36 = vpop.f32.mrf.mxu1 }
 0x249   : > { %v896_v55 = vmul.f32 %v857_v36, %v627_v47  ;;  %v936_v57 = vsel %vm902_vm10, %v897_v49, 0.0  ;;  %v927_v36 = vsel %vm902_vm10, %v894_v32, 0.0 }
 0x24b   : > { %v933_v62 = vsel %vm902_vm10, %v896_v55, 0.0 }
 0x24e   : > { %v1379_v38 = vpop.f32.mrf.mxu1 }
 0x24f   : > { %v899_v40 = vmul.f32 %v1379_v38, %v642_v35  ;;  %v647_v35 = vadd.f32 %v1768_v48, %v646_v7  ;;  %v924_v38 = vsel %vm902_vm10, %v893_v34, 0.0  ;;  %v909_v48 = vsel %vm902_vm10, %v1780_v63, 0.0 }
 0x250   : > { %v867_v41 = vpop.f32.mrf.mxu1 }
 0x251   : > { %v898_v43 = vmul.f32 %v867_v41, %v637_v39  ;;  %v942_v44 = vsel %vm902_vm10, %v899_v40, 0.0  ;;  %v891_v40 = vmul.f32 %v1784_v2, %v602_v3  ;;  %v921_v41 = vsel %vm902_vm10, %v892_v31, 0.0 }
 0x252   : > { %943 = vadd.xlane.f32.xlu1 %v942_v44  ;;  %v903_v2 = vsel %vm902_vm10, %v1774_v56, 0.0 }
 0x253   : > { %v939_v50 = vsel %vm902_vm10, %v898_v43, 0.0  ;;  %v918_v42 = vsel %vm902_vm10, %v891_v40, 0.0  ;;  %v915_v43 = vsel %vm902_vm10, %v890_v5, 0.0 }
 0x256   : > { %940 = vadd.xlane.f32.xlu1 %v939_v50  ;;  %v1382_v51 = vpop.f32.mrf.mxu1 }
 0x257   : > { %v901_v52 = vmul.f32 %v1382_v51, %v652_v46 }
 0x258   : > { %v877_v37 = vpop.f32.mrf.mxu1 }
 0x259   : > { %v948_v58 = vsel %vm902_vm10, %v901_v52, 0.0  ;;  %v900_v15 = vmul.f32 %v877_v37, %v647_v35 }
 0x25a   : > { %937 = vadd.xlane.f32.xlu1 %v936_v57  ;;  %949 = vadd.xlane.f32.xlu0 %v948_v58 }
 0x25b   : > { %v945_v39 = vsel %vm902_vm10, %v900_v15, 0.0 }
 0x25e   : > { %934 = vadd.xlane.f32.xlu1 %v933_v62 }
 0x262   : > { %931 = vadd.xlane.f32.xlu1 %v930_v33 }
 0x266   : > { %928 = vadd.xlane.f32.xlu1 %v927_v36 }
 0x26a   : > { %925 = vadd.xlane.f32.xlu1 %v924_v38 }
 0x26e   : > { %946 = vadd.xlane.f32.xlu1 %v945_v39 }
 0x272   : > { %922 = vadd.xlane.f32.xlu1 %v921_v41 }
 0x276   : > { %919 = vadd.xlane.f32.xlu1 %v918_v42 }
 0x27a   : > { %916 = vadd.xlane.f32.xlu1 %v915_v43 }
 0x27e   : > { %913 = vadd.xlane.f32.xlu1 %v912_v0 }
 0x282   : > { %910 = vadd.xlane.f32.xlu1 %v909_v48 }
 0x286   : > { %907 = vadd.xlane.f32.xlu1 %v906_v1 }
 0x28a   : > { %904 = vadd.xlane.f32.xlu1 %v903_v2 }
 0x2db   : > { %v944_v4 = vpop.xlane.xlu1 %943 }
 0x2dc   : > { %v1265_v49 = vmul.f32 -1.442695, %v944_v4 }
 0x2df   : > { %v941_v8 = vpop.xlane.xlu1 %940 }
 0x2e0   : > { %v1264_v51 = vmul.f32 -1.442695, %v941_v8 }
 0x2e3   : > { %v938_v44 = vpop.xlane.xlu1 %937  ;;  %v950_v61 = vpop.xlane.xlu0 %949 }
 0x2e4   : > { %v1267_v45 = vmul.f32 -1.442695, %v950_v61  ;;  %v1263_v56 = vmul.f32 -1.442695, %v938_v44 }
 0x2e6   : > { %1454 = vpow2.f32 %v1267_v45 }
 0x2e7   : > { %v935_v46 = vpop.xlane.xlu1 %934  ;;  %1456 = vpow2.f32 %v1265_v49 }
 0x2e8   : > { %v1262_v57 = vmul.f32 -1.442695, %v935_v46 }
 0x2eb   : > { %v932_v63 = vpop.xlane.xlu1 %931 }
 0x2ec   : > { %v1261_v58 = vmul.f32 -1.442695, %v932_v63 }
 0x2ef   : > { %v929_v47 = vpop.xlane.xlu1 %928 }
 0x2f0   : > { %v1260_v60 = vmul.f32 -1.442695, %v929_v47 }
 0x2f3   : > { %v926_v50 = vpop.xlane.xlu1 %925  ;;  %v1455_v54 = vpop.eup %1454 }
 0x2f4   : > { %v1014_v52 = vadd.f32 1.0, %v1455_v54  ;;  %v1259_v62 = vmul.f32 -1.442695, %v926_v50  ;;  %v1457_v32 = vpop.eup %1456 }
 0x2f5   : > { %v1012_v35 = vadd.f32 1.0, %v1457_v32 }
 0x2f6   : > { %1458 = vrcp.f32 %v1014_v52 }
 0x2f7   : > { %v947_v53 = vpop.xlane.xlu1 %946  ;;  %1460 = vpow2.f32 %v1264_v51 }
 0x2f8   : > { %v1266_v55 = vmul.f32 -1.442695, %v947_v53  ;;  %1462 = vpow2.f32 %v1263_v56 }
 0x2fa   : > { %1464 = vpow2.f32 %v1266_v55 }
 0x2fb   : > { %v923_v59 = vpop.xlane.xlu1 %922  ;;  %1466 = vpow2.f32 %v1262_v57 }
 0x2fc   : > { %1468 = vpow2.f32 %v1261_v58  ;;  %v1258_v33 = vmul.f32 -1.442695, %v923_v59 }
 0x2fd   : > { %1470 = vpow2.f32 %v1260_v60 }
 0x2fe   : > { %1472 = vpow2.f32 %v1259_v62 }
 0x2ff   : > { %v920_v16 = vpop.xlane.xlu1 %919  ;;  %1474 = vpow2.f32 %v1258_v33 }
 0x300   : > { %v1257_v7 = vmul.f32 -1.442695, %v920_v16 }
 0x302   : > { %1476 = vpow2.f32 %v1257_v7 }
 0x303   : > { %v917_v34 = vpop.xlane.xlu1 %916  ;;  %v1459_v36 = vpop.eup %1458  ;;  %1478 = vrcp.f32 %v1012_v35 }
 0x304   : > { %v1256_v37 = vmul.f32 -1.442695, %v917_v34  ;;  %v1461_v11 = vpop.eup %1460  ;;  %v1062_v15 = vmul.f32 %v1459_v36, %v1743_v30 }
 0x305   : > { %v1463_v38 = vpop.eup %1462  ;;  %v1011_v6 = vadd.f32 1.0, %v1461_v11 }
 0x306   : > { %1384 = vmatpush3.msra.mxu0 %v1062_v15  ;;  %1480 = vpow2.f32 %v1256_v37  ;;  %v1010_v5 = vadd.f32 1.0, %v1463_v38 }
 0x307   : > { %v914_v3 = vpop.xlane.xlu1 %913  ;;  %v1465_v31 = vpop.eup %1464  ;;  %1385 = vmatprep.subr.mxu0 %v1572_v14 }
 0x308   : > { %v1255_v39 = vmul.f32 -1.442695, %v914_v3  ;;  %v1013_v40 = vadd.f32 1.0, %v1465_v31  ;;  %v1467_v41 = vpop.eup %1466 }
 0x309   : > { %v1469_v42 = vpop.eup %1468  ;;  %v1009_v30 = vadd.f32 1.0, %v1467_v41 }
 0x30a   : > { %1482 = vpow2.f32 %v1255_v39  ;;  %v1471_v48 = vpop.eup %1470  ;;  %v1008_v1 = vadd.f32 1.0, %v1469_v42 }
 0x30b   : > { %1484 = vrcp.f32 %v1013_v40  ;;  %v911_v43 = vpop.xlane.xlu1 %910  ;;  %v1473_v2 = vpop.eup %1472  ;;  %v1007_v44 = vadd.f32 1.0, %v1471_v48 }
 0x30c   : > { %v1254_v0 = vmul.f32 -1.442695, %v911_v43  ;;  %1486 = vrcp.f32 %v1011_v6  ;;  %v1475_v61 = vpop.eup %1474  ;;  %v1006_v45 = vadd.f32 1.0, %v1473_v2 }
 0x30d   : > { %1488 = vrcp.f32 %v1010_v5  ;;  %v1005_v50 = vadd.f32 1.0, %v1475_v61 }
 0x30e   : > { %1490 = vpow2.f32 %v1254_v0 }
 0x30f   : > { %v908_v4 = vpop.xlane.xlu1 %907  ;;  %1492 = vrcp.f32 %v1009_v30  ;;  %v1477_v63 = vpop.eup %1476 }
 0x310   : > { %v1253_v8 = vmul.f32 -1.442695, %v908_v4  ;;  %1494 = vrcp.f32 %v1008_v1  ;;  %v1479_v49 = vpop.eup %1478  ;;  %v1004_v52 = vadd.f32 1.0, %v1477_v63 }
 0x311   : > { %v1060_v60 = vmul.f32 %v1479_v49, %v1735_v28 }
 0x312   : > { %1496 = vpow2.f32 %v1253_v8 }
 0x313   : > { %v905_v46 = vpop.xlane.xlu1 %904  ;;  %1498 = vrcp.f32 %v1007_v44  ;;  %v1481_v54 = vpop.eup %1480 }
 0x314   : > { %v1252_v47 = vmul.f32 -1.442695, %v905_v46  ;;  %1500 = vrcp.f32 %v1006_v45  ;;  %v1003_v53 = vadd.f32 1.0, %v1481_v54 }
 0x316   : > { %1502 = vpow2.f32 %v1252_v47 }
 0x317   : > { %v1483_v51 = vpop.eup %1482  ;;  %1504 = vrcp.f32 %v1005_v50 }
 0x318   : > { %v1485_v56 = vpop.eup %1484  ;;  %1506 = vrcp.f32 %v1004_v52  ;;  %v1002_v59 = vadd.f32 1.0, %v1483_v51 }
 0x319   : > { %v1061_v55 = vmul.f32 %v1485_v56, %v1740_v29  ;;  %v1487_v57 = vpop.eup %1486  ;;  %1508 = vrcp.f32 %v1003_v53 }
 0x31a   : > { %v1489_v58 = vpop.eup %1488  ;;  %v1059_v32 = vmul.f32 %v1487_v57, %v1730_v27  ;;  %1510 = vrcp.f32 %v1002_v59 }
 0x31b   : > { %1386 = vmatpush3.msra.mxu0 %v1061_v55  ;;  %v1491_v62 = vpop.eup %1490  ;;  %v1058_v29 = vmul.f32 %v1489_v58, %v1723_v26 }
 0x31c   : > { %1387 = vmatprep.subr.mxu0 %v1572_v14  ;;  %v1001_v16 = vadd.f32 1.0, %v1491_v62  ;;  %v1493_v33 = vpop.eup %1492 }
 0x31d   : > { %1388 = vmatpush3.msra.mxu0 %v1060_v60  ;;  %v1495_v7 = vpop.eup %1494  ;;  %v1057_v35 = vmul.f32 %v1493_v33, %v1720_v25 }
 0x31e   : > { %1389 = vmatprep.subr.mxu0 %v1572_v14  ;;  %1512 = vrcp.f32 %v1001_v16  ;;  %v1056_v37 = vmul.f32 %v1495_v7, %v1713_v24 }
 0x31f   : > { %1390 = vmatpush3.msra.mxu0 %v1059_v32  ;;  %v1497_v34 = vpop.eup %1496 }
 0x320   : > { %1391 = vmatprep.subr.mxu0 %v1572_v14  ;;  %v1000_v28 = vadd.f32 1.0, %v1497_v34  ;;  %v1499_v36 = vpop.eup %1498 }
 0x321   : > { %1392 = vmatpush3.msra.mxu0 %v1058_v29  ;;  %v1501_v27 = vpop.eup %1500  ;;  %v1055_v15 = vmul.f32 %v1499_v36, %v1710_v23 }
 0x322   : > { %1393 = vmatprep.subr.mxu0 %v1572_v14  ;;  %1514 = vrcp.f32 %v1000_v28  ;;  %v1054_v25 = vmul.f32 %v1501_v27, %v1703_v22 }
 0x323   : > { %1394 = vmatpush3.msra.mxu0 %v1057_v35  ;;  %v1503_v11 = vpop.eup %1502 }
 0x324   : > { %1395 = vmatprep.subr.mxu0 %v1572_v14  ;;  %v999_v26 = vadd.f32 1.0, %v1503_v11  ;;  %v1505_v38 = vpop.eup %1504 }
 0x325   : > { %1396 = vmatpush3.msra.mxu0 %v1056_v37  ;;  %v1507_v3 = vpop.eup %1506  ;;  %v1053_v24 = vmul.f32 %v1505_v38, %v1700_v21 }
 0x326   : > { %1397 = vmatprep.subr.mxu0 %v1572_v14  ;;  %1516 = vrcp.f32 %v999_v26  ;;  %v1509_v31 = vpop.eup %1508  ;;  %v1052_v39 = vmul.f32 %v1507_v3, %v1693_v20 }
 0x327   : > { %1398 = vmatpush3.msra.mxu0 %v1055_v15  ;;  %v1511_v23 = vpop.eup %1510  ;;  %v1051_v6 = vmul.f32 %v1509_v31, %v1690_v19 }
 0x328   : > { %1399 = vmatprep.subr.mxu0 %v1572_v14  ;;  %v1050_v22 = vmul.f32 %v1511_v23, %v1683_v18  ;;  %v1574_v18 = vmov 1.0  }
 0x329   : > { %1400 = vmatpush3.msra.mxu0 %v1054_v25 }
 0x32a   : > { %1401 = vmatprep.subr.mxu0 %v1572_v14 }
 0x32b   : > { %1402 = vmatpush3.msra.mxu0 %v1053_v24  ;;  %v1513_v40 = vpop.eup %1512 }
 0x32c   : > { %1403 = vmatprep.subr.mxu0 %v1572_v14  ;;  %v1049_v21 = vmul.f32 %v1513_v40, %v1680_v17  ;;  %v1063_v17 = vld [vmem:[#allocation4] sm:$0x3] }
 0x32d   : > { %1404 = vmatpush3.msra.mxu0 %v1052_v39 }
 0x32e   : > { %1405 = vmatprep.subr.mxu0 %v1572_v14 }
 0x32f   : > { %1406 = vmatpush3.msra.mxu0 %v1051_v6  ;;  %v1515_v41 = vpop.eup %1514 }
 0x330   : > { %1407 = vmatprep.subr.mxu0 %v1572_v14  ;;  %v1048_v20 = vmul.f32 %v1515_v41, %v1668_v13 }
 0x331   : > { %1408 = vmatpush3.msra.mxu0 %v1050_v22 }
 0x332   : > { %1409 = vmatprep.subr.mxu0 %v1572_v14 }
 0x333   : > { %1410 = vmatpush3.msra.mxu0 %v1049_v21  ;;  %v1517_v5 = vpop.eup %1516 }
 0x334   : > { %1411 = vmatprep.subr.mxu0 %v1572_v14  ;;  %v1047_v19 = vmul.f32 %v1517_v5, %v1665_v12 }
 0x335   : > { %1412 = vmatpush3.msra.mxu0 %v1048_v20 }
 0x336   : > { %1413 = vmatprep.subr.mxu0 %v1572_v14 }
 0x337   : > { %1414 = vmatpush3.msra.mxu0 %v1047_v19 }
 0x338   : > { %1416 = vmatmul.mubr.msk.f32.vlgmr.msra.gmra.mxu0 %vm430_vm6, %v1574_v18 }
 0x3f8   : > { %v1130_v42 = vpop.f32.mrf.mxu0 }
 0x3f9   : > { %v1134_v12 = vadd.f32 %v1130_v42, %v1063_v17 }
 0x3fa   : > { %v1417_v13 = vpop.f32.mrf.mxu0 }
 0x3fb   : > { %1136 = vst.msk [vmem:[#allocation4] sm:$0x3] %vm1135_vm12, %v1134_v12 }
 0x3fc   : > { %1531 = shalt.err (!%p1528_p0)
}
 0x3fd   : > { %1419 = dma.vmem_to_hbm [thread:$0]  (%p1860_p7), %s1147_s30, 32, %s1891_s7, [#allocation5]  }
 0x3fe   : > { %1555 = dma.done.wait (%p1860_p7), [#allocation5], 32  }
 0x3ff   : > { %1557 = vsyncadd (%p1860_p7), [#allocation5], 4294967264 }
 0x400 PF: > { %s18_s26 = sadd.s32 1, %s1568_s26   ;;  %s1893_s24 = smov %s1564_s25 }
 0x401   : > { %p15_p1 = scmp.ge.s32.totalorder %s18_s26, 5   ;;  %s1894_s25 = smov %s1896_s28 }
 0x403   :  { %17 = sbr.rel (!%p15_p1) target bundleno = 2 (0x2), region = 83 }
 0x408   :  { %1159 = vsyncpa [#allocation5], 1 }
 0x409   :  { %1161 = vsyncpa [#allocation5 + $0x1], 1 }

</bundles_post_ra>
